<compile_context>
chip_gen: v6e
topology: v6e:2x2x1
jax: 0.10.0
libtpu: 0.0.40
codegen_flags: <defaults>
</compile_context>

<pallas_src>
import numpy as np
import jax
import jax.numpy as jnp
from jax.experimental import pallas as pl
from jax.experimental.pallas import tpu as pltpu

# ----- problem sizes (small, consistent with a waveform discriminator) -----
B = 2        # batch
C = 1        # waveform channels
T = 128      # time samples
K = 16       # conv kernel == stride (non-overlapping frames)
F = T // K   # frames per example
H = 32       # hidden width
M = B * F    # elements of each discriminator output (MSE mean divisor)
CK = C * K


def _adv_loss_kernel(xr_ref, xf_ref, w1b_ref, b1t_ref, w2b_ref, b2_ref, losses_ref):
    """Fused discriminator forward (real + fake) + the three LSGAN MSE losses.

    xr_ref, xf_ref : VMEM (B, C*T) f32  lane-dense waveforms (real / fake)
    w1b_ref        : VMEM (C*T, F*H)    block-diagonal conv-as-matmul weight
    b1t_ref        : VMEM (1, F*H)      conv bias tiled per frame
    w2b_ref        : VMEM (F*H, F)      block-diagonal output projection
    b2_ref         : SMEM (1,)          output projection bias
    losses_ref     : SMEM (3,) f32 out  [d_real_loss, d_fake_loss, g_loss]
    """
    w1b = w1b_ref[...]
    b1t = b1t_ref[...]
    w2b = w2b_ref[...]
    b2 = b2_ref[0]

    # Discriminator forward. Two tiny MXU dots per path; with the block-diagonal
    # formulation the contraction is 128-deep and lane-dense. f32 operands kept
    # (dispatch-bound kernel); cast to bf16 here for v6e/v7x if desired.
    hr = jnp.maximum(
        jnp.dot(xr_ref[...], w1b, preferred_element_type=jnp.float32) + b1t, 0.0)
    hf = jnp.maximum(
        jnp.dot(xf_ref[...], w1b, preferred_element_type=jnp.float32) + b1t, 0.0)
    # Projection is now a 256-deep, F-wide contraction (no longer a degenerate
    # N=1 column), so it also rides the already-issued MXU path.
    d_real = jnp.dot(hr, w2b, preferred_element_type=jnp.float32) + b2   # (B, F)
    d_fake = jnp.dot(hf, w2b, preferred_element_type=jnp.float32) + b2   # (B, F)

    inv_m = 1.0 / float(d_real.shape[0] * d_real.shape[1])   # compile-time constant

    # Epilogue: two squared reduces + one plain sum (single-vreg operands),
    # d_fake_loss recovered algebraically from g_loss.
    rr = d_real - 1.0                       # label +1 for D(real)
    sum_rr2 = jnp.sum(rr * rr)              # Σ (d_real - 1)^2
    sum_df = jnp.sum(d_fake)                # Σ d_fake
    sum_df2 = jnp.sum(d_fake * d_fake)      # Σ d_fake^2

    g_loss = sum_df2 * inv_m                                   # label 0 for G
    losses_ref[0] = sum_rr2 * inv_m                            # d_real_loss
    losses_ref[1] = g_loss + 2.0 * sum_df * inv_m + 1.0        # label -1 for D(fake)
    losses_ref[2] = g_loss


def _fused_adv_losses(xr, xf, w1b, b1t, w2b, b2):
    """xr, xf: (B, C*T) f32. Returns (3,) f32 [d_real_loss, d_fake_loss, g_loss]."""
    bx, ct = xr.shape
    fh = w1b.shape[1]
    fr = w2b.shape[1]
    flops = 2 * (2 * bx * ct * fh) + 2 * (2 * bx * fh * fr)
    bytes_accessed = 4 * (2 * bx * ct + ct * fh + fh + fh * fr + 1 + 3)
    return pl.pallas_call(
        _adv_loss_kernel,
        out_shape=jax.ShapeDtypeStruct((3,), jnp.float32),
        in_specs=[
            pl.BlockSpec(memory_space=pltpu.MemorySpace.VMEM),   # x_real (B, C*T)
            pl.BlockSpec(memory_space=pltpu.MemorySpace.VMEM),   # x_fake (B, C*T)
            pl.BlockSpec(memory_space=pltpu.MemorySpace.VMEM),   # W1b
            pl.BlockSpec(memory_space=pltpu.MemorySpace.VMEM),   # b1 tiled
            pl.BlockSpec(memory_space=pltpu.MemorySpace.VMEM),   # W2b
            pl.BlockSpec(memory_space=pltpu.MemorySpace.SMEM),   # b2 scalar
        ],
        out_specs=pl.BlockSpec(memory_space=pltpu.MemorySpace.SMEM),
        cost_estimate=pl.CostEstimate(
            flops=flops, transcendentals=0, bytes_accessed=bytes_accessed),
    )(xr, xf, w1b, b1t, w2b, b2)


def wave_adversarial_loss(iteration, x_fake, x_real, packed_params, grad=True):
    """Forward-pass semantics of WaveAdversarialLoss(loss='L2'), c_real=c_fake=None.

    `iteration` only gates the optimizer step in the original module (omitted).
    """
    del iteration
    w1b, b1t, w2b, b2 = packed_params
    # (B, C, T) -> (B, C*T): free view, lane-dense (time on lanes). The framing
    # (and any C>1 interleave) is already baked into the block-diagonal W1b.
    xr = x_real.astype(jnp.float32).reshape(x_real.shape[0], -1)
    xf = x_fake.astype(jnp.float32).reshape(x_fake.shape[0], -1)

    losses = _fused_adv_losses(xr, xf, w1b, b1t, w2b, b2)
    if grad:
        # d_loss = d_real_loss + d_fake_loss feeds only backward()/optimizer (omitted).
        return {"g_loss": losses[2],
                "d_real_loss": losses[0],
                "d_fake_loss": losses[1]}
    return {"g_loss": losses[2]}


# ----------------- synthetic discriminator parameters ----------------------

def init_discriminator_params(key):
    k1, k2 = jax.random.split(key)
    w1 = jax.random.normal(k1, (CK, H), dtype=jnp.float32) * (1.0 / jnp.sqrt(CK))
    b1 = jnp.zeros((H,), dtype=jnp.float32)
    w2 = jax.random.normal(k2, (H,), dtype=jnp.float32) * (1.0 / jnp.sqrt(H))
    b2 = jnp.zeros((1,), dtype=jnp.float32)
    return w1, b1, w2, b2


def pack_discriminator_params(w1, b1, w2, b2):
    """Fold the strided-conv framing into block-diagonal weights (done ONCE)."""
    w1 = np.asarray(w1, np.float32).reshape(C, K, H)
    w2 = np.asarray(w2, np.float32).reshape(H)
    w1b = np.zeros((C * T, F * H), np.float32)
    w2b = np.zeros((F * H, F), np.float32)
    for f in range(F):
        for c in range(C):
            # input element (c, f*K+k) lives at column c*T + f*K + k of (B, C*T)
            w1b[c * T + f * K: c * T + (f + 1) * K, f * H:(f + 1) * H] = w1[c]
        w2b[f * H:(f + 1) * H, f] = w2
    b1t = np.tile(np.asarray(b1, np.float32).reshape(1, H), (1, F))   # (1, F*H)
    b2a = np.asarray(b2, np.float32).reshape(1)
    return (jnp.asarray(w1b), jnp.asarray(b1t), jnp.asarray(w2b), jnp.asarray(b2a))


if __name__ == "__main__":
    key = jax.random.PRNGKey(0)
    k_fake, k_real, k_params = jax.random.split(key, 3)

    x_fake = jax.random.normal(k_fake, (B, C, T), dtype=jnp.float32)
    x_real = jax.random.normal(k_real, (B, C, T), dtype=jnp.float32)
    w1, b1, w2, b2 = init_discriminator_params(k_params)
    packed = pack_discriminator_params(w1, b1, w2, b2)

    # Run inside a jit (dispatch-latency dominated kernel: keep it fused).
    loss_fn = jax.jit(lambda xf, xr: wave_adversarial_loss(0, xf, xr, packed, grad=True))
    losses = loss_fn(x_fake, x_real)
    losses = jax.tree_util.tree_map(jax.block_until_ready, losses)

    assert set(losses.keys()) == {"g_loss", "d_real_loss", "d_fake_loss"}
    for v in losses.values():
        assert jnp.isfinite(v)

    # grad=False path (generator-only step)
    g_only = jax.jit(lambda xf, xr: wave_adversarial_loss(0, xf, xr, packed, grad=False))(
        x_fake, x_real)
    g_only = jax.tree_util.tree_map(jax.block_until_ready, g_only)
    assert set(g_only.keys()) == {"g_loss"}

    # cross-check against a pure-JAX reference of the same discriminator
    def _to_frames(x):
        b, c, t = x.shape
        f = t // K
        return x.reshape(b, c, f, K).transpose(0, 2, 1, 3).reshape(b * f, c * K)

    def _ref_d(frames):
        h = jnp.maximum(frames @ w1 + b1.reshape(1, H), 0.0)
        return h @ w2.reshape(H, 1) + b2[0]

    dr = _ref_d(_to_frames(x_real))
    df = _ref_d(_to_frames(x_fake))
    ref = {
        "d_real_loss": jnp.mean((dr - 1.0) ** 2),
        "d_fake_loss": jnp.mean((df + 1.0) ** 2),
        "g_loss": jnp.mean(df ** 2),
    }
    for name in ref:
        assert jnp.allclose(losses[name], ref[name], rtol=5e-5, atol=1e-5), name
    assert jnp.allclose(g_only["g_loss"], ref["g_loss"], rtol=5e-5, atol=1e-5)

    print("KERNEL_OK")
</pallas_src>

<mosaic_0001>
module attributes {stable_mosaic.version = 11 : i64} {
  func.func @_adv_loss_kernel(%arg0: memref<2x128xf32, #tpu.memory_space<vmem>>, %arg1: memref<2x128xf32, #tpu.memory_space<vmem>>, %arg2: memref<128x256xf32, #tpu.memory_space<vmem>>, %arg3: memref<1x256xf32, #tpu.memory_space<vmem>>, %arg4: memref<256x8xf32, #tpu.memory_space<vmem>>, %arg5: memref<1xf32, #tpu.memory_space<smem>>, %arg6: memref<3xf32, #tpu.memory_space<smem>>) attributes {dimension_semantics = [], scalar_prefetch = 0 : i64, scratch_operands = 0 : i64, tpu.core_type = #tpu.core_type<tc>} {
    %c0 = arith.constant 0 : index
    %c0_0 = arith.constant 0 : index
    %0 = vector.load %arg2[%c0, %c0_0] : memref<128x256xf32, #tpu.memory_space<vmem>>, vector<128x256xf32>
    %c0_1 = arith.constant 0 : index
    %c0_2 = arith.constant 0 : index
    %1 = vector.load %arg3[%c0_1, %c0_2] : memref<1x256xf32, #tpu.memory_space<vmem>>, vector<1x256xf32>
    %c0_3 = arith.constant 0 : index
    %c0_4 = arith.constant 0 : index
    %2 = vector.load %arg4[%c0_3, %c0_4] : memref<256x8xf32, #tpu.memory_space<vmem>>, vector<256x8xf32>
    %c0_5 = arith.constant 0 : index
    %3 = memref.load %arg5[%c0_5] : memref<1xf32, #tpu.memory_space<smem>>
    %c0_6 = arith.constant 0 : index
    %c0_7 = arith.constant 0 : index
    %4 = vector.load %arg0[%c0_6, %c0_7] : memref<2x128xf32, #tpu.memory_space<vmem>>, vector<2x128xf32>
    %cst = arith.constant dense<0.000000e+00> : vector<2x256xf32>
    %5 = tpu.matmul %4, %0, %cst {dimension_numbers = #tpu.dot_dimension_numbers<[1], [0], [0], [1], [0, 0, 1, 1], [], []>} : vector<2x128xf32>, vector<128x256xf32>, vector<2x256xf32> -> vector<2x256xf32>
    %6 = vector.broadcast %1 : vector<1x256xf32> to vector<2x256xf32>
    %7 = arith.addf %5, %6 : vector<2x256xf32>
    %cst_8 = arith.constant 0.000000e+00 : f32
    %8 = vector.broadcast %cst_8 : f32 to vector<2x256xf32>
    %9 = arith.maximumf %7, %8 : vector<2x256xf32>
    %c0_9 = arith.constant 0 : index
    %c0_10 = arith.constant 0 : index
    %10 = vector.load %arg1[%c0_9, %c0_10] : memref<2x128xf32, #tpu.memory_space<vmem>>, vector<2x128xf32>
    %cst_11 = arith.constant dense<0.000000e+00> : vector<2x256xf32>
    %11 = tpu.matmul %10, %0, %cst_11 {dimension_numbers = #tpu.dot_dimension_numbers<[1], [0], [0], [1], [0, 0, 1, 1], [], []>} : vector<2x128xf32>, vector<128x256xf32>, vector<2x256xf32> -> vector<2x256xf32>
    %12 = vector.broadcast %1 : vector<1x256xf32> to vector<2x256xf32>
    %13 = arith.addf %11, %12 : vector<2x256xf32>
    %cst_12 = arith.constant 0.000000e+00 : f32
    %14 = vector.broadcast %cst_12 : f32 to vector<2x256xf32>
    %15 = arith.maximumf %13, %14 : vector<2x256xf32>
    %cst_13 = arith.constant dense<0.000000e+00> : vector<2x8xf32>
    %16 = tpu.matmul %9, %2, %cst_13 {dimension_numbers = #tpu.dot_dimension_numbers<[1], [0], [0], [1], [0, 0, 1, 1], [], []>} : vector<2x256xf32>, vector<256x8xf32>, vector<2x8xf32> -> vector<2x8xf32>
    %17 = vector.broadcast %3 : f32 to vector<2x8xf32>
    %18 = arith.addf %16, %17 : vector<2x8xf32>
    %cst_14 = arith.constant dense<0.000000e+00> : vector<2x8xf32>
    %19 = tpu.matmul %15, %2, %cst_14 {dimension_numbers = #tpu.dot_dimension_numbers<[1], [0], [0], [1], [0, 0, 1, 1], [], []>} : vector<2x256xf32>, vector<256x8xf32>, vector<2x8xf32> -> vector<2x8xf32>
    %20 = vector.broadcast %3 : f32 to vector<2x8xf32>
    %21 = arith.addf %19, %20 : vector<2x8xf32>
    %cst_15 = arith.constant 1.000000e+00 : f32
    %22 = vector.broadcast %cst_15 : f32 to vector<2x8xf32>
    %23 = arith.subf %18, %22 : vector<2x8xf32>
    %24 = arith.mulf %23, %23 : vector<2x8xf32>
    %25 = vector.shape_cast %24 : vector<2x8xf32> to vector<1x2x8xf32>
    %cst_16 = arith.constant dense<0.000000e+00> : vector<1xf32>
    %26 = vector.multi_reduction <add>, %25, %cst_16 [1, 2] : vector<1x2x8xf32> to vector<1xf32>
    %27 = vector.shape_cast %26 : vector<1xf32> to vector<1x1x1xf32>
    %28 = vector.extract %27[0, 0, 0] : f32 from vector<1x1x1xf32>
    %29 = vector.shape_cast %21 : vector<2x8xf32> to vector<1x2x8xf32>
    %cst_17 = arith.constant dense<0.000000e+00> : vector<1xf32>
    %30 = vector.multi_reduction <add>, %29, %cst_17 [1, 2] : vector<1x2x8xf32> to vector<1xf32>
    %31 = vector.shape_cast %30 : vector<1xf32> to vector<1x1x1xf32>
    %32 = vector.extract %31[0, 0, 0] : f32 from vector<1x1x1xf32>
    %33 = arith.mulf %21, %21 : vector<2x8xf32>
    %34 = vector.shape_cast %33 : vector<2x8xf32> to vector<1x2x8xf32>
    %cst_18 = arith.constant dense<0.000000e+00> : vector<1xf32>
    %35 = vector.multi_reduction <add>, %34, %cst_18 [1, 2] : vector<1x2x8xf32> to vector<1xf32>
    %36 = vector.shape_cast %35 : vector<1xf32> to vector<1x1x1xf32>
    %37 = vector.extract %36[0, 0, 0] : f32 from vector<1x1x1xf32>
    %cst_19 = arith.constant 6.250000e-02 : f32
    %38 = arith.mulf %37, %cst_19 : f32
    %cst_20 = arith.constant 6.250000e-02 : f32
    %39 = arith.mulf %28, %cst_20 : f32
    %c0_21 = arith.constant 0 : index
    %40 = memref.load %arg6[%c0_21] : memref<3xf32, #tpu.memory_space<smem>>
    memref.store %39, %arg6[%c0_21] : memref<3xf32, #tpu.memory_space<smem>>
    %cst_22 = arith.constant 2.000000e+00 : f32
    %41 = arith.mulf %cst_22, %32 : f32
    %cst_23 = arith.constant 6.250000e-02 : f32
    %42 = arith.mulf %41, %cst_23 : f32
    %43 = arith.addf %38, %42 : f32
    %cst_24 = arith.constant 1.000000e+00 : f32
    %44 = arith.addf %43, %cst_24 : f32
    %c1 = arith.constant 1 : index
    %45 = memref.load %arg6[%c1] : memref<3xf32, #tpu.memory_space<smem>>
    memref.store %44, %arg6[%c1] : memref<3xf32, #tpu.memory_space<smem>>
    %c2 = arith.constant 2 : index
    %46 = memref.load %arg6[%c2] : memref<3xf32, #tpu.memory_space<smem>>
    memref.store %38, %arg6[%c2] : memref<3xf32, #tpu.memory_space<smem>>
    return
  }
}

</mosaic_0001>

<bundles_post_ra>
// kernel: _lambda_.1
= control target key start
LH: loop header
LB: loop body
LE: loop exit
PB: predicated region body
PF: predicated region fallthrough
CT: control target
= control target key end

     0   :  { %12 = vsyncpa [#allocation4], 0  ;;  %s689_s0 = inlined_call_operand.vmem [shape: f32[2,128], index: 0, kind: input, shape index: {}]   ;;  %s690_s1 = inlined_call_operand.vmem [shape: f32[2,128], index: 1, kind: input, shape index: {}]   ;;  %s691_s2 = inlined_call_operand.hbm [shape: f32[128,256], index: 2, kind: input, shape index: {}]   ;;  %s692_s3 = inlined_call_operand.vmem [shape: f32[1,256], index: 3, kind: input, shape index: {}]   ;;  %s693_s4 = inlined_call_operand.hbm [shape: f32[256,8], index: 4, kind: input, shape index: {}]   ;;  %s694_s5 = inlined_call_operand.<no memory space> [shape: f32[1], index: 5, kind: input, shape index: {}]   ;;  %s695_s6 = inlined_call_operand.vmem [shape: f32[3], index: 6, kind: output, shape index: {}]  }
   0x1   :  { %13 = vsyncpa [#allocation7], 0 }
   0x2   :  { %14 = vsyncpa [#allocation5], 0  ;;  %s625_s21 = smov [#allocation3]  }
   0x3   :  { %s24_s22 = sshll.u32 %s625_s21, 4  ;;  %s25_s22 = int_to_ptr.vmem [resolvable:$true] %s24_s22 }
   0x4   :  { %s575_s23 = scalar_lea.vmem %s25_s22, 4096  ;;  %p580_p1 = scmp.lt.s32.totalorder %s25_s22, %s25_s22 }
   0x5   :  { %p576_p0 = scmp.ne.s32.totalorder %s25_s22, %s575_s23  ;;  %p581_p2 = scmp.lt.s32.totalorder %s575_s23, %s575_s23 }
   0x7   :  { %p582_p3 = por %p581_p2, %p580_p1 }
   0x9   :  { %p583_p4 = pnand %p582_p3, %p576_p0 }
   0xb   :  { %586 = shalt.err (!%p583_p4)
}
   0xc   :  { %s626_s24 = smov 256   ;;  %s627_s25 = smov 16  }
   0xd   :  { %30 = dma.hbm_to_vmem [thread:$0]  %s691_s2, 4096, %s25_s22, [#allocation4], %s626_s24, %s626_s24, %s627_s25  }
   0xe   :  { %s628_s28 = smov [#allocation6]  }
   0xf   :  { %s38_s29 = sshll.u32 %s628_s28, 4  ;;  %s39_s29 = int_to_ptr.vmem [resolvable:$true] %s38_s29 }
  0x10   :  { %s595_s30 = scalar_lea.vmem %s39_s29, 4096  ;;  %p600_p6 = scmp.lt.s32.totalorder %s39_s29, %s39_s29 }
  0x11   :  { %p596_p5 = scmp.ne.s32.totalorder %s39_s29, %s595_s30  ;;  %p601_p7 = scmp.lt.s32.totalorder %s595_s30, %s595_s30 }
  0x13   :  { %p602_p8 = por %p601_p7, %p600_p6 }
  0x15   :  { %p603_p9 = pnand %p602_p8, %p596_p5 }
  0x17   :  { %606 = shalt.err (!%p603_p9)
}
  0x18   :  { %s629_s7 = smov 128   ;;  %s630_s8 = smov 8  }
  0x19   :  { %44 = dma.hbm_to_vmem [thread:$0]  %s693_s4, 4096, %s39_s29, [#allocation7], %s629_s7, %s629_s7, %s630_s8  }
  0x1a   :  { %619 = dma.done.wait [#allocation4], 4096  }
  0x1b   :  { %620 = vsyncadd [#allocation4], 4294963200 }
  0x1c   :  { %621 = dma.done.wait [#allocation7], 4096  }
  0x1d   :  { %622 = vsyncadd [#allocation7], 4294963200  ;;  %v631_v0 = vmov 0.0   ;;  %v84_v1 = vld [vmem:[#allocation3 + $0xf8] sm:$0xff]  ;;  %v83_v2 = vld [vmem:[#allocation3 + $0xf0] sm:$0xff]  ;;  %vm421_vm0 = vcmask 58368  }
  0x1e   :  { %195 = vmatprep.mubr.f32.mxu0 %v631_v0  ;;  %269 = vmatprep.mubr.f32.mxu1 %v631_v0  ;;  %v82_v3 = vld [vmem:[#allocation3 + $0xe8] sm:$0xff]  ;;  %v81_v4 = vld [vmem:[#allocation3 + $0xe0] sm:$0xff]  ;;  %v80_v5 = vld [vmem:[#allocation3 + $0xd8] sm:$0xff]  ;;  %s471_s22 = sshll.u32 %s695_s6, 4  ;;  %s472_s22 = int_to_ptr.vmem [resolvable:$true] %s471_s22 }
  0x1f   :  { %131 = vmatprep.subr.mxu0 %v84_v1  ;;  %205 = vmatprep.subr.mxu1 %v84_v1  ;;  %v79_v6 = vld [vmem:[#allocation3 + $0xd0] sm:$0xff]  ;;  %v78_v7 = vld [vmem:[#allocation3 + $0xc8] sm:$0xff]  ;;  %v77_v8 = vld [vmem:[#allocation3 + $0xc0] sm:$0xff]  ;;  %s607_s25 = scalar_lea.vmem %s472_s22, 16  ;;  %p612_p11 = scmp.lt.s32.totalorder %s472_s22, %s472_s22 }
  0x20   :  { %132 = vmatpush1.msra.mxu0 %v83_v2  ;;  %206 = vmatpush1.msra.mxu1 %v83_v2  ;;  %v76_v9 = vld [vmem:[#allocation3 + $0xb8] sm:$0xff]  ;;  %v75_v10 = vld [vmem:[#allocation3 + $0xb0] sm:$0xff]  ;;  %v74_v11 = vld [vmem:[#allocation3 + $0xa8] sm:$0xff]  ;;  %p608_p10 = scmp.ne.s32.totalorder %s472_s22, %s607_s25  ;;  %p613_p12 = scmp.lt.s32.totalorder %s607_s25, %s607_s25 }
  0x21   :  { %133 = vmatprep.subr.mxu0 %v82_v3  ;;  %207 = vmatprep.subr.mxu1 %v82_v3  ;;  %v73_v12 = vld [vmem:[#allocation3 + $0xa0] sm:$0xff]  ;;  %v72_v13 = vld [vmem:[#allocation3 + $0x98] sm:$0xff]  ;;  %v71_v14 = vld [vmem:[#allocation3 + $0x90] sm:$0xff]  ;;  %v121_v3 = vlaneseq }
  0x22   :  { %134 = vmatpush1.msra.mxu0 %v81_v4  ;;  %208 = vmatpush1.msra.mxu1 %v81_v4  ;;  %v70_v15 = vld [vmem:[#allocation3 + $0x88] sm:$0xff]  ;;  %v69_v16 = vld [vmem:[#allocation3 + $0x80] sm:$0xff]  ;;  %v68_v17 = vld [vmem:[#allocation3 + $0x78] sm:$0xff]  ;;  %p614_p13 = por %p613_p12, %p612_p11 }
  0x23   :  { %135 = vmatprep.subr.mxu0 %v80_v5  ;;  %209 = vmatprep.subr.mxu1 %v80_v5  ;;  %v67_v18 = vld [vmem:[#allocation3 + $0x70] sm:$0xff]  ;;  %v66_v19 = vld [vmem:[#allocation3 + $0x68] sm:$0xff]  ;;  %v65_v20 = vld [vmem:[#allocation3 + $0x60] sm:$0xff]  ;;  %v122_v4 = vshrl.u32 %v121_v3, 7 }
  0x24   :  { %136 = vmatpush1.msra.mxu0 %v79_v6  ;;  %210 = vmatpush1.msra.mxu1 %v79_v6  ;;  %v64_v21 = vld [vmem:[#allocation3 + $0x58] sm:$0xff]  ;;  %v63_v22 = vld [vmem:[#allocation3 + $0x50] sm:$0xff]  ;;  %v62_v23 = vld [vmem:[#allocation3 + $0x48] sm:$0xff]  ;;  %p615_p0 = pnand %p614_p13, %p608_p10 }
  0x25   :  { %137 = vmatprep.subr.mxu0 %v78_v7  ;;  %211 = vmatprep.subr.mxu1 %v78_v7  ;;  %v61_v24 = vld [vmem:[#allocation3 + $0x40] sm:$0xff]  ;;  %v60_v25 = vld [vmem:[#allocation3 + $0x38] sm:$0xff]  ;;  %v59_v26 = vld [vmem:[#allocation3 + $0x30] sm:$0xff]  ;;  %v123_v5 = vsub.s32 0, %v122_v4  ;;  %v127_v7 = vsub.s32 1, %v122_v4 }
  0x26   :  { %138 = vmatpush1.msra.mxu0 %v77_v8  ;;  %212 = vmatpush1.msra.mxu1 %v77_v8  ;;  %v58_v27 = vld [vmem:[#allocation3 + $0x28] sm:$0xff]  ;;  %v57_v28 = vld [vmem:[#allocation3 + $0x20] sm:$0xff]  ;;  %v56_v29 = vld [vmem:[#allocation3 + $0x18] sm:$0xff] }
  0x27   :  { %139 = vmatprep.subr.mxu0 %v76_v9  ;;  %213 = vmatprep.subr.mxu1 %v76_v9  ;;  %v55_v30 = vld [vmem:[#allocation3 + $0x10] sm:$0xff]  ;;  %v54_v31 = vld [vmem:[#allocation3 + $0x8] sm:$0xff]  ;;  %v53_v32 = vld [vmem:[#allocation3] sm:$0xff] }
  0x28   :  { %140 = vmatpush1.msra.mxu0 %v75_v10  ;;  %214 = vmatpush1.msra.mxu1 %v75_v10  ;;  %v119_v33 = vld [vmem:[%s689_s0] sm:$0x3]  ;;  %v117_v35 = vld [vmem:[#allocation6 + $0xf8] sm:$0xff]  ;;  %v116_v37 = vld [vmem:[#allocation6 + $0xf0] sm:$0xff] }
  0x29   :  { %141 = vmatprep.subr.mxu0 %v74_v11  ;;  %215 = vmatprep.subr.mxu1 %v74_v11  ;;  %v204_v34 = vld [vmem:[%s690_s1] sm:$0x3]  ;;  %v101_v36 = vld [vmem:[#allocation6 + $0x78] sm:$0xff]  ;;  %v100_v38 = vld [vmem:[#allocation6 + $0x70] sm:$0xff] }
  0x2a   :  { %142 = vmatpush1.msra.mxu0 %v73_v12  ;;  %216 = vmatpush1.msra.mxu1 %v73_v12  ;;  %v115_v39 = vld [vmem:[#allocation6 + $0xe8] sm:$0xff]  ;;  %v114_v41 = vld [vmem:[#allocation6 + $0xe0] sm:$0xff]  ;;  %v113_v43 = vld [vmem:[#allocation6 + $0xd8] sm:$0xff] }
  0x2b   :  { %143 = vmatprep.subr.mxu0 %v72_v13  ;;  %217 = vmatprep.subr.mxu1 %v72_v13  ;;  %v99_v40 = vld [vmem:[#allocation6 + $0x68] sm:$0xff]  ;;  %v98_v42 = vld [vmem:[#allocation6 + $0x60] sm:$0xff]  ;;  %v97_v44 = vld [vmem:[#allocation6 + $0x58] sm:$0xff] }
  0x2c   :  { %144 = vmatpush1.msra.mxu0 %v71_v14  ;;  %218 = vmatpush1.msra.mxu1 %v71_v14  ;;  %v112_v45 = vld [vmem:[#allocation6 + $0xd0] sm:$0xff]  ;;  %v111_v47 = vld [vmem:[#allocation6 + $0xc8] sm:$0xff]  ;;  %v110_v49 = vld [vmem:[#allocation6 + $0xc0] sm:$0xff] }
  0x2d   :  { %145 = vmatprep.subr.mxu0 %v70_v15  ;;  %219 = vmatprep.subr.mxu1 %v70_v15  ;;  %v96_v46 = vld [vmem:[#allocation6 + $0x50] sm:$0xff]  ;;  %v95_v48 = vld [vmem:[#allocation6 + $0x48] sm:$0xff]  ;;  %v94_v50 = vld [vmem:[#allocation6 + $0x40] sm:$0xff] }
  0x2e   :  { %146 = vmatpush1.msra.mxu0 %v69_v16  ;;  %220 = vmatpush1.msra.mxu1 %v69_v16  ;;  %v109_v51 = vld [vmem:[#allocation6 + $0xb8] sm:$0xff]  ;;  %v108_v53 = vld [vmem:[#allocation6 + $0xb0] sm:$0xff]  ;;  %v107_v55 = vld [vmem:[#allocation6 + $0xa8] sm:$0xff] }
  0x2f   :  { %147 = vmatprep.subr.mxu0 %v68_v17  ;;  %221 = vmatprep.subr.mxu1 %v68_v17  ;;  %v93_v52 = vld [vmem:[#allocation6 + $0x38] sm:$0xff]  ;;  %v92_v54 = vld [vmem:[#allocation6 + $0x30] sm:$0xff]  ;;  %v91_v56 = vld [vmem:[#allocation6 + $0x28] sm:$0xff] }
  0x30   :  { %148 = vmatpush1.msra.mxu0 %v67_v18  ;;  %222 = vmatpush1.msra.mxu1 %v67_v18  ;;  %v106_v57 = vld [vmem:[#allocation6 + $0xa0] sm:$0xff]  ;;  %v105_v59 = vld [vmem:[#allocation6 + $0x98] sm:$0xff]  ;;  %v104_v61 = vld [vmem:[#allocation6 + $0x90] sm:$0xff] }
  0x31   :  { %149 = vmatprep.subr.mxu0 %v66_v19  ;;  %223 = vmatprep.subr.mxu1 %v66_v19  ;;  %v90_v58 = vld [vmem:[#allocation6 + $0x20] sm:$0xff]  ;;  %v89_v60 = vld [vmem:[#allocation6 + $0x18] sm:$0xff]  ;;  %v88_v62 = vld [vmem:[#allocation6 + $0x10] sm:$0xff] }
  0x32   :  { %150 = vmatpush1.msra.mxu0 %v65_v20  ;;  %224 = vmatpush1.msra.mxu1 %v65_v20  ;;  %v103_v63 = vld [vmem:[#allocation6 + $0x88] sm:$0xff]  ;;  %v102_v1 = vld [vmem:[#allocation6 + $0x80] sm:$0xff] }
  0x33   :  { %151 = vmatprep.subr.mxu0 %v64_v21  ;;  %225 = vmatprep.subr.mxu1 %v64_v21  ;;  %v87_v0 = vld [vmem:[#allocation6 + $0x8] sm:$0xff]  ;;  %v86_v2 = vld [vmem:[#allocation6] sm:$0xff] }
  0x34   :  { %152 = vmatpush1.msra.mxu0 %v63_v22  ;;  %226 = vmatpush1.msra.mxu1 %v63_v22  ;;  %v85_v6 = vld [vmem:[%s692_s3] sm:$0x3] }
  0x35   :  { %153 = vmatprep.subr.mxu0 %v62_v23  ;;  %227 = vmatprep.subr.mxu1 %v62_v23  ;;  %v124_v8 = vrot.slane %v85_v6, %v123_v5  ;;  %v128_v9 = vrot.slane %v85_v6, %v127_v7 }
  0x36   :  { %154 = vmatpush1.msra.mxu0 %v61_v24  ;;  %228 = vmatpush1.msra.mxu1 %v61_v24  ;;  %v278_v24 = vstv %s694_s5 }
  0x37   :  { %155 = vmatprep.subr.mxu0 %v60_v25  ;;  %229 = vmatprep.subr.mxu1 %v60_v25 }
  0x38   :  { %156 = vmatpush1.msra.mxu0 %v59_v26  ;;  %230 = vmatpush1.msra.mxu1 %v59_v26 }
  0x39   :  { %157 = vmatprep.subr.mxu0 %v58_v27  ;;  %231 = vmatprep.subr.mxu1 %v58_v27 }
  0x3a   :  { %158 = vmatpush1.msra.mxu0 %v57_v28  ;;  %232 = vmatpush1.msra.mxu1 %v57_v28 }
  0x3b   :  { %159 = vmatprep.subr.mxu0 %v56_v29  ;;  %233 = vmatprep.subr.mxu1 %v56_v29 }
  0x3c   :  { %160 = vmatpush1.msra.mxu0 %v55_v30  ;;  %234 = vmatpush1.msra.mxu1 %v55_v30 }
  0x3d   :  { %161 = vmatprep.subr.mxu0 %v54_v31  ;;  %235 = vmatprep.subr.mxu1 %v54_v31 }
  0x3e   :  { %162 = vmatpush1.msra.mxu0 %v53_v32  ;;  %236 = vmatpush1.msra.mxu1 %v53_v32 }
  0x3f   :  { %196 = vmatmul.mubr.f32.vlgmr.msra.gmra.mxu0 %v119_v33  ;;  %270 = vmatmul.mubr.f32.vlgmr.msra.gmra.mxu1 %v204_v34 }
  0x40   :  { %483 = vmatprep.subr.mxu0 %v117_v35  ;;  %518 = vmatprep.subr.mxu1 %v117_v35 }
  0x41   :  { %484 = vmatpush3.msra.mxu0 %v101_v36  ;;  %519 = vmatpush3.msra.mxu1 %v101_v36 }
  0x42   :  { %485 = vmatprep.subr.mxu0 %v116_v37  ;;  %520 = vmatprep.subr.mxu1 %v116_v37 }
  0x43   :  { %486 = vmatpush3.msra.mxu0 %v100_v38  ;;  %521 = vmatpush3.msra.mxu1 %v100_v38 }
  0x44   :  { %487 = vmatprep.subr.mxu0 %v115_v39  ;;  %522 = vmatprep.subr.mxu1 %v115_v39 }
  0x45   :  { %488 = vmatpush3.msra.mxu0 %v99_v40  ;;  %523 = vmatpush3.msra.mxu1 %v99_v40 }
  0x46   :  { %489 = vmatprep.subr.mxu0 %v114_v41  ;;  %524 = vmatprep.subr.mxu1 %v114_v41 }
  0x47   :  { %490 = vmatpush3.msra.mxu0 %v98_v42  ;;  %525 = vmatpush3.msra.mxu1 %v98_v42 }
  0x48   :  { %491 = vmatprep.subr.mxu0 %v113_v43  ;;  %526 = vmatprep.subr.mxu1 %v113_v43 }
  0x49   :  { %492 = vmatpush3.msra.mxu0 %v97_v44  ;;  %527 = vmatpush3.msra.mxu1 %v97_v44 }
  0x4a   :  { %493 = vmatprep.subr.mxu0 %v112_v45  ;;  %528 = vmatprep.subr.mxu1 %v112_v45 }
  0x4b   :  { %494 = vmatpush3.msra.mxu0 %v96_v46  ;;  %529 = vmatpush3.msra.mxu1 %v96_v46 }
  0x4c   :  { %495 = vmatprep.subr.mxu0 %v111_v47  ;;  %530 = vmatprep.subr.mxu1 %v111_v47 }
  0x4d   :  { %496 = vmatpush3.msra.mxu0 %v95_v48  ;;  %531 = vmatpush3.msra.mxu1 %v95_v48 }
  0x4e   :  { %497 = vmatprep.subr.mxu0 %v110_v49  ;;  %532 = vmatprep.subr.mxu1 %v110_v49 }
  0x4f   :  { %498 = vmatpush3.msra.mxu0 %v94_v50  ;;  %533 = vmatpush3.msra.mxu1 %v94_v50 }
  0x50   :  { %499 = vmatprep.subr.mxu0 %v109_v51  ;;  %534 = vmatprep.subr.mxu1 %v109_v51 }
  0x51   :  { %500 = vmatpush3.msra.mxu0 %v93_v52  ;;  %535 = vmatpush3.msra.mxu1 %v93_v52 }
  0x52   :  { %501 = vmatprep.subr.mxu0 %v108_v53  ;;  %536 = vmatprep.subr.mxu1 %v108_v53 }
  0x53   :  { %502 = vmatpush3.msra.mxu0 %v92_v54  ;;  %537 = vmatpush3.msra.mxu1 %v92_v54 }
  0x54   :  { %503 = vmatprep.subr.mxu0 %v107_v55  ;;  %538 = vmatprep.subr.mxu1 %v107_v55 }
  0x55   :  { %504 = vmatpush3.msra.mxu0 %v91_v56  ;;  %539 = vmatpush3.msra.mxu1 %v91_v56 }
  0x56   :  { %505 = vmatprep.subr.mxu0 %v106_v57  ;;  %540 = vmatprep.subr.mxu1 %v106_v57 }
  0x57   :  { %506 = vmatpush3.msra.mxu0 %v90_v58  ;;  %541 = vmatpush3.msra.mxu1 %v90_v58 }
  0x58   :  { %507 = vmatprep.subr.mxu0 %v105_v59  ;;  %542 = vmatprep.subr.mxu1 %v105_v59 }
  0x59   :  { %508 = vmatpush3.msra.mxu0 %v89_v60  ;;  %543 = vmatpush3.msra.mxu1 %v89_v60 }
  0x5a   :  { %509 = vmatprep.subr.mxu0 %v104_v61  ;;  %544 = vmatprep.subr.mxu1 %v104_v61 }
  0x5b   :  { %510 = vmatpush3.msra.mxu0 %v88_v62  ;;  %545 = vmatpush3.msra.mxu1 %v88_v62 }
  0x5c   :  { %511 = vmatprep.subr.mxu0 %v103_v63  ;;  %546 = vmatprep.subr.mxu1 %v103_v63 }
  0x5d   :  { %512 = vmatpush3.msra.mxu0 %v87_v0  ;;  %547 = vmatpush3.msra.mxu1 %v87_v0 }
  0x5e   :  { %513 = vmatprep.subr.mxu0 %v102_v1  ;;  %548 = vmatprep.subr.mxu1 %v102_v1 }
  0x5f   :  { %514 = vmatpush3.msra.mxu0 %v86_v2  ;;  %549 = vmatpush3.msra.mxu1 %v86_v2 }
  0xff   :  { %v197_v10 = vpop.f32.mrf.mxu0  ;;  %v271_v11 = vpop.f32.mrf.mxu1 }
 0x100   :  { %v272_v12 = vadd.f32 %v271_v11, %v124_v8  ;;  %v198_v13 = vadd.f32 %v197_v10, %v124_v8 }
 0x101   :  { %v199_v14 = vpop.f32.mrf.mxu0  ;;  %v273_v15 = vpop.f32.mrf.mxu1 }
 0x102   :  { %v200_v16 = vadd.f32 %v199_v14, %v128_v9  ;;  %v274_v17 = vadd.f32 %v273_v15, %v128_v9  ;;  %v276_v18 = vmax.f32 %v272_v12, 0.0  ;;  %v202_v21 = vmax.f32 %v198_v13, 0.0 }
 0x104   :  { %v203_v19 = vmax.f32 %v200_v16, 0.0  ;;  %v277_v20 = vmax.f32 %v274_v17, 0.0 }
 0x106   :  { %343 = vmatprep.mubr.f32.mxu0 %v203_v19  ;;  %413 = vmatprep.mubr.f32.mxu1 %v277_v20 }
 0x107   :  { %344 = vmatmul.mubr.f32.vlgmr.msra.gmra.mxu0 %v202_v21  ;;  %414 = vmatmul.mubr.f32.vlgmr.msra.gmra.mxu1 %v276_v18 }
 0x1c7   :  { %v515_v22 = vpop.f32.mrf.mxu0  ;;  %v550_v23 = vpop.f32.mrf.mxu1 }
 0x1c9   :  { %v516_v25 = vpop.f32.mrf.mxu0  ;;  %v551_v26 = vpop.f32.mrf.mxu1 }
 0x1ca   :  { %v517_v27 = vadd.f32 %v516_v25, %v515_v22  ;;  %v552_v28 = vadd.f32 %v551_v26, %v550_v23 }
 0x1cc   :  { %v346_v29 = vadd.f32 %v517_v27, %v278_v24  ;;  %v416_v30 = vadd.f32 %v552_v28, %v278_v24 }
 0x1ce   :  { %v442_v31 = vmul.f32 %v416_v30, %v416_v30  ;;  %v482_v32 = vadd.f32 -1.0, %v346_v29  ;;  %v432_v36 = vsel %vm421_vm0, %v416_v30, 0.0 }
 0x1d0   :  { %v443_v33 = vsel %vm421_vm0, %v442_v31, 0.0  ;;  %v420_v34 = vmul.f32 %v482_v32, %v482_v32 }
 0x1d1   :  { %444 = vadd.xlane.f32.xlu1 %v443_v33 }
 0x1d2   :  { %v422_v35 = vsel %vm421_vm0, %v420_v34, 0.0 }
 0x1d3   :  { %423 = vadd.xlane.f32.xlu0 %v422_v35 }
 0x1d7   :  { %433 = vadd.xlane.f32.xlu0 %v432_v36 }
 0x25a   :  { %v445_v37 = vpop.xlane.xlu1 %444 }
 0x25b   :  { %v446_v38 = vrot.slane %v445_v37, 4 }
 0x25c   :  { %v424_v39 = vpop.xlane.xlu0 %423 }
 0x25d   :  { %v447_v40 = vadd.f32 %v446_v38, %v445_v37  ;;  %v425_v41 = vrot.slane %v424_v39, 4 }
 0x25f   :  { %v426_v42 = vadd.f32 %v425_v41, %v424_v39  ;;  %v448_v43 = vrot.slane %v447_v40, 2 }
 0x260   :  { %v434_v44 = vpop.xlane.xlu0 %433 }
 0x261   :  { %v427_v45 = vrot.slane %v426_v42, 2  ;;  %v435_v46 = vrot.slane %v434_v44, 4  ;;  %v449_v49 = vadd.f32 %v448_v43, %v447_v40 }
 0x263   :  { %v436_v47 = vadd.f32 %v435_v46, %v434_v44  ;;  %v428_v48 = vadd.f32 %v427_v45, %v426_v42  ;;  %v450_v54 = vrot.slane %v449_v49, 1 }
 0x265   :  { %v437_v50 = vrot.slane %v436_v47, 2  ;;  %v429_v51 = vrot.slane %v428_v48, 1  ;;  %v451_v57 = vadd.f32 %v450_v54, %v449_v49 }
 0x267   :  { %v438_v52 = vadd.f32 %v437_v50, %v436_v47  ;;  %v430_v53 = vadd.f32 %v429_v51, %v428_v48 }
 0x269   :  { %553 = vpush %v430_v53  ;;  %v439_v55 = vrot.slane %v438_v52, 1 }
 0x26b   :  { %v440_v56 = vadd.f32 %v439_v55, %v438_v52 }
 0x26d   :  { %555 = vpush %v440_v56 }
 0x26e   :  { %557 = vpush %v451_v57 }
 0x29a   :  { %s554_s5 = spop %553 }
 0x29b   :  { %s454_s14 = smul.f32 0.0625, %s554_s5 }
 0x29d   :  { %456 = sst [smem:[#allocation8]] %s454_s14 }
 0x29e   :  { %s556_s15 = spop %555 }
 0x29f   :  { %s457_s16 = smul.f32 2.0, %s556_s15  ;;  %s558_s17 = spop %557 }
 0x2a0   :  { %s453_s18 = smul.f32 0.0625, %s558_s17 }
 0x2a1   :  { %s458_s19 = smul.f32 0.0625, %s457_s16 }
 0x2a2   :  { %464 = sst [smem:[#allocation8 + $0x2]] %s453_s18 }
 0x2a3   :  { %s459_s23 = sadd.f32 %s458_s19, %s453_s18 }
 0x2a5   :  { %s460_s24 = sadd.f32 1.0, %s459_s23 }
 0x2a7   :  { %462 = sst [smem:[#allocation8 + $0x1]] %s460_s24 }
 0x2a8   :  { %618 = shalt.err (!%p615_p0)
}
 0x2a9   :  { %s632_s26 = smov [#allocation8]  }
 0x2aa   :  { %474 = dma.smem_to_vmem %s632_s26, 16, %s472_s22, [#allocation5]  }
 0x2ab   :  { %623 = dma.done.wait [#allocation5], 16  }
 0x2ac   :  { %624 = vsyncadd [#allocation5], 4294967280 }
 0x2ad   :  { %478 = sfence }
 0x2ae   :  { %479 = vsyncpa [#allocation4], 1 }
 0x2af   :  { %480 = vsyncpa [#allocation7], 1 }
 0x2b0   :  { %481 = vsyncpa [#allocation5], 1 }

</bundles_post_ra>
